<compile_context>
chip_gen: v7x
topology: tpu7x:2x2x1
jax: 0.10.0
libtpu: 0.0.40
codegen_flags: <defaults>
</compile_context>

<pallas_src>
import math

import jax
import jax.numpy as jnp
from jax.experimental import pallas as pl
from jax.experimental.pallas import tpu as pltpu

LANE = 128     # vreg lane width
SUBLANE = 8    # vreg sublane count (f32)


def _round_up(x, m):
    return ((x + m - 1) // m) * m


def actor_kernel(x_ref, w1_ref, b1_ref, w2_ref, b2_ref, w3_ref, b3_ref, out_ref):
    # Fused 3-layer MLP: two ReLU-activated linears + final linear head.
    # MXU operands are bf16 (weights stored bf16, activations cast just before
    # each dot); accumulation, bias add and ReLU are f32.
    x = x_ref[...].astype(jnp.bfloat16)
    h1 = jnp.dot(x, w1_ref[...], preferred_element_type=jnp.float32) + b1_ref[...]
    h1 = jnp.maximum(h1, 0.0)
    h2 = jnp.dot(h1.astype(jnp.bfloat16), w2_ref[...],
                 preferred_element_type=jnp.float32) + b2_ref[...]
    h2 = jnp.maximum(h2, 0.0)
    q = jnp.dot(h2.astype(jnp.bfloat16), w3_ref[...],
                preferred_element_type=jnp.float32) + b3_ref[...]
    out_ref[...] = q.astype(out_ref.dtype)


def pad_params(w1, b1, w2, b2, w3, b3):
    """One-time parameter prep: pad hidden dims to 128 lanes, cast weights to bf16.

    Zero padding is semantics-preserving: padded hidden lanes are ReLU(0 + 0) = 0
    and feed zero weight rows.  The K dim of W1 (true obs width) and the output
    dim of W3 (true action width) are intentionally left unpadded so the kernel
    reads/writes no padded HBM traffic for activations.
    """
    def padw(w, rows, cols):
        return jnp.pad(
            w, ((0, rows - w.shape[0]), (0, cols - w.shape[1]))
        ).astype(jnp.bfloat16)

    def padb(b, cols):
        return jnp.pad(b, ((0, 0), (0, cols - b.shape[1]))).astype(jnp.float32)

    d_in, h1 = w1.shape
    _, h2 = w2.shape
    _, a = w3.shape
    h1p = _round_up(h1, LANE)
    h2p = _round_up(h2, LANE)
    return (
        padw(w1, d_in, h1p), padb(b1, h1p),   # (D,   H1p) bf16, (1, H1p) f32
        padw(w2, h1p, h2p),  padb(b2, h2p),   # (H1p, H2p) bf16, (1, H2p) f32
        padw(w3, h2p, a),    padb(b3, a),     # (H2p, A)   bf16, (1, A)   f32
    )


def actor_forward(x, w1p, b1p, w2p, b2p, w3p, b3p, *, block_b=1024):
    """Run the fused Actor MLP. Expects params prepared by pad_params()."""
    B, D = x.shape
    A = w3p.shape[1]

    # Batch tile: multiple of 8 sublanes, sized so the grid has >= 2 steps
    # whenever B > 8 (keeps both v7x TensorCores busy), capped at block_b to
    # amortize per-grid-step overhead on v5e/v6e.  Ragged last block is fine:
    # OOB rows are read unspecified (rows are independent) and writes clipped.
    TB = min(block_b, max(SUBLANE, _round_up(pl.cdiv(B, 2), SUBLANE)))
    grid = (pl.cdiv(B, TB),)

    resident = lambda a: pl.BlockSpec(a.shape, lambda i: (0, 0))

    return pl.pallas_call(
        actor_kernel,
        out_shape=jax.ShapeDtypeStruct((B, A), jnp.float32),
        grid=grid,
        in_specs=[
            pl.BlockSpec((TB, D), lambda i: (i, 0)),     # activations: tiled over batch
            resident(w1p), resident(b1p),                # weights/biases: VMEM-resident
            resident(w2p), resident(b2p),
            resident(w3p), resident(b3p),
        ],
        out_specs=pl.BlockSpec((TB, A), lambda i: (i, 0)),
        compiler_params=pltpu.CompilerParams(
            dimension_semantics=("parallel",),  # v7x: shard batch across both TCs
        ),
    )(x, w1p, b1p, w2p, b2p, w3p, b3p)


def kaiming_normal(key, fan_in, fan_out):
    # kaiming_normal_(nonlinearity='relu') on a (out, in) weight -> std = sqrt(2/fan_in).
    # Stored transposed (in, out) so the kernel computes plain x @ W.
    std = math.sqrt(2.0 / fan_in)
    return (std * jax.random.normal(key, (fan_in, fan_out))).astype(jnp.float32)


def linear_bias(key, fan_in, fan_out):
    # PyTorch default Linear bias init: U(-1/sqrt(fan_in), 1/sqrt(fan_in)).
    bound = 1.0 / math.sqrt(fan_in)
    return jax.random.uniform(
        key, (1, fan_out), minval=-bound, maxval=bound
    ).astype(jnp.float32)


def _reference(x, w1, b1, w2, b2, w3, b3):
    h = jnp.maximum(x @ w1 + b1, 0.0)
    h = jnp.maximum(h @ w2 + b2, 0.0)
    return h @ w3 + b3


if __name__ == "__main__":
    # Shapes consistent with the module: size_ob prod = 16, H1 = 32, H2 = 32, actions = 4.
    B, D_IN, H1, H2, A = 8, 16, 32, 32, 4

    key = jax.random.PRNGKey(0)
    k_x, k_w1, k_b1, k_w2, k_b2, k_w3, k_b3, k_x2 = jax.random.split(key, 8)

    x = jax.random.normal(k_x, (B, D_IN), dtype=jnp.float32)

    w1 = kaiming_normal(k_w1, D_IN, H1)
    b1 = linear_bias(k_b1, D_IN, H1)
    w2 = kaiming_normal(k_w2, H1, H2)
    b2 = linear_bias(k_b2, H1, H2)
    # actor head: layer_init(..., std=0.01) with ppo=False still uses kaiming_normal
    w3 = kaiming_normal(k_w3, H2, A)
    b3 = linear_bias(k_b3, H2, A)

    # One-time prep: pad hidden dims, cast weights to bf16.
    w1p, b1p, w2p, b2p, w3p, b3p = pad_params(w1, b1, w2, b2, w3, b3)

    qvalues = actor_forward(x, w1p, b1p, w2p, b2p, w3p, b3p)
    jax.block_until_ready(qvalues)

    ref = _reference(x, w1, b1, w2, b2, w3, b3)
    assert qvalues.shape == (B, A)
    # bf16 MXU inputs (f32 accumulate) -> compare against the f32 reference with
    # a bf16-appropriate tolerance.
    assert jnp.allclose(qvalues, ref, atol=5e-2, rtol=5e-2)

    # Second check: batch not a multiple of the tile size -> ragged last block,
    # grid of 2 steps (both TCs on v7x).
    B2 = 37
    x2 = jax.random.normal(k_x2, (B2, D_IN), dtype=jnp.float32)
    q2 = actor_forward(x2, w1p, b1p, w2p, b2p, w3p, b3p)
    jax.block_until_ready(q2)
    ref2 = _reference(x2, w1, b1, w2, b2, w3, b3)
    assert q2.shape == (B2, A)
    assert jnp.allclose(q2, ref2, atol=5e-2, rtol=5e-2)

    print("KERNEL_OK")
</pallas_src>

<mosaic_0001>
module attributes {stable_mosaic.version = 11 : i64} {
  func.func @actor_kernel(%arg0: i32, %arg1: memref<8x16xf32, #tpu.memory_space<vmem>>, %arg2: memref<16x128xbf16, #tpu.memory_space<vmem>>, %arg3: memref<1x128xf32, #tpu.memory_space<vmem>>, %arg4: memref<128x128xbf16, #tpu.memory_space<vmem>>, %arg5: memref<1x128xf32, #tpu.memory_space<vmem>>, %arg6: memref<128x4xbf16, #tpu.memory_space<vmem>>, %arg7: memref<1x4xf32, #tpu.memory_space<vmem>>, %arg8: memref<8x4xf32, #tpu.memory_space<vmem>>) attributes {dimension_semantics = [#tpu.dimension_semantics<parallel>], iteration_bounds = array<i64: 1>, scalar_prefetch = 0 : i64, scratch_operands = 0 : i64, tpu.core_type = #tpu.core_type<tc>, window_params = [{transform_indices = @transform_0, window_bounds = array<i64: 8, 16>}, {pipeline_mode = #tpu.pipeline_mode<synchronous>, transform_indices = @transform_1, window_bounds = array<i64: 16, 128>}, {pipeline_mode = #tpu.pipeline_mode<synchronous>, transform_indices = @transform_2, window_bounds = array<i64: 1, 128>}, {pipeline_mode = #tpu.pipeline_mode<synchronous>, transform_indices = @transform_3, window_bounds = array<i64: 128, 128>}, {pipeline_mode = #tpu.pipeline_mode<synchronous>, transform_indices = @transform_4, window_bounds = array<i64: 1, 128>}, {pipeline_mode = #tpu.pipeline_mode<synchronous>, transform_indices = @transform_5, window_bounds = array<i64: 128, 4>}, {pipeline_mode = #tpu.pipeline_mode<synchronous>, transform_indices = @transform_6, window_bounds = array<i64: 1, 4>}, {transform_indices = @transform_7, window_bounds = array<i64: 8, 4>}]} {
    %c0 = arith.constant 0 : index
    %c0_0 = arith.constant 0 : index
    %0 = vector.load %arg1[%c0, %c0_0] : memref<8x16xf32, #tpu.memory_space<vmem>>, vector<8x16xf32>
    %1 = arith.truncf %0 : vector<8x16xf32> to vector<8x16xbf16>
    %c0_1 = arith.constant 0 : index
    %c0_2 = arith.constant 0 : index
    %2 = vector.load %arg2[%c0_1, %c0_2] : memref<16x128xbf16, #tpu.memory_space<vmem>>, vector<16x128xbf16>
    %cst = arith.constant dense<0.000000e+00> : vector<8x128xf32>
    %3 = tpu.matmul %1, %2, %cst {dimension_numbers = #tpu.dot_dimension_numbers<[1], [0], [0], [1], [0, 0, 1, 1], [], []>} : vector<8x16xbf16>, vector<16x128xbf16>, vector<8x128xf32> -> vector<8x128xf32>
    %c0_3 = arith.constant 0 : index
    %c0_4 = arith.constant 0 : index
    %4 = vector.load %arg3[%c0_3, %c0_4] : memref<1x128xf32, #tpu.memory_space<vmem>>, vector<1x128xf32>
    %5 = vector.broadcast %4 : vector<1x128xf32> to vector<8x128xf32>
    %6 = arith.addf %3, %5 : vector<8x128xf32>
    %cst_5 = arith.constant 0.000000e+00 : f32
    %7 = vector.broadcast %cst_5 : f32 to vector<8x128xf32>
    %8 = arith.maximumf %6, %7 : vector<8x128xf32>
    %9 = arith.truncf %8 : vector<8x128xf32> to vector<8x128xbf16>
    %c0_6 = arith.constant 0 : index
    %c0_7 = arith.constant 0 : index
    %10 = vector.load %arg4[%c0_6, %c0_7] : memref<128x128xbf16, #tpu.memory_space<vmem>>, vector<128x128xbf16>
    %cst_8 = arith.constant dense<0.000000e+00> : vector<8x128xf32>
    %11 = tpu.matmul %9, %10, %cst_8 {dimension_numbers = #tpu.dot_dimension_numbers<[1], [0], [0], [1], [0, 0, 1, 1], [], []>} : vector<8x128xbf16>, vector<128x128xbf16>, vector<8x128xf32> -> vector<8x128xf32>
    %c0_9 = arith.constant 0 : index
    %c0_10 = arith.constant 0 : index
    %12 = vector.load %arg5[%c0_9, %c0_10] : memref<1x128xf32, #tpu.memory_space<vmem>>, vector<1x128xf32>
    %13 = vector.broadcast %12 : vector<1x128xf32> to vector<8x128xf32>
    %14 = arith.addf %11, %13 : vector<8x128xf32>
    %cst_11 = arith.constant 0.000000e+00 : f32
    %15 = vector.broadcast %cst_11 : f32 to vector<8x128xf32>
    %16 = arith.maximumf %14, %15 : vector<8x128xf32>
    %17 = arith.truncf %16 : vector<8x128xf32> to vector<8x128xbf16>
    %c0_12 = arith.constant 0 : index
    %c0_13 = arith.constant 0 : index
    %18 = vector.load %arg6[%c0_12, %c0_13] : memref<128x4xbf16, #tpu.memory_space<vmem>>, vector<128x4xbf16>
    %cst_14 = arith.constant dense<0.000000e+00> : vector<8x4xf32>
    %19 = tpu.matmul %17, %18, %cst_14 {dimension_numbers = #tpu.dot_dimension_numbers<[1], [0], [0], [1], [0, 0, 1, 1], [], []>} : vector<8x128xbf16>, vector<128x4xbf16>, vector<8x4xf32> -> vector<8x4xf32>
    %c0_15 = arith.constant 0 : index
    %c0_16 = arith.constant 0 : index
    %20 = vector.load %arg7[%c0_15, %c0_16] : memref<1x4xf32, #tpu.memory_space<vmem>>, vector<1x4xf32>
    %21 = vector.broadcast %20 : vector<1x4xf32> to vector<8x4xf32>
    %22 = arith.addf %19, %21 : vector<8x4xf32>
    %c0_17 = arith.constant 0 : index
    %c0_18 = arith.constant 0 : index
    %23 = vector.load %arg8[%c0_17, %c0_18] : memref<8x4xf32, #tpu.memory_space<vmem>>, vector<8x4xf32>
    tpu.vector_store %arg8[%c0_17, %c0_18], %22 {strides = array<i32>} : memref<8x4xf32, #tpu.memory_space<vmem>>, vector<8x4xf32>,
    return
  }
  func.func @transform_0(%arg0: i32) -> (i32, i32) {
    %c0_i32 = arith.constant 0 : i32
    %c0_i32_0 = arith.constant 0 : i32
    return %arg0, %c0_i32 : i32, i32
  }
  func.func @transform_1(%arg0: i32) -> (i32, i32) {
    %c0_i32 = arith.constant 0 : i32
    %c0_i32_0 = arith.constant 0 : i32
    %c0_i32_1 = arith.constant 0 : i32
    return %c0_i32, %c0_i32_0 : i32, i32
  }
  func.func @transform_2(%arg0: i32) -> (i32, i32) {
    %c0_i32 = arith.constant 0 : i32
    %c0_i32_0 = arith.constant 0 : i32
    %c0_i32_1 = arith.constant 0 : i32
    return %c0_i32, %c0_i32_0 : i32, i32
  }
  func.func @transform_3(%arg0: i32) -> (i32, i32) {
    %c0_i32 = arith.constant 0 : i32
    %c0_i32_0 = arith.constant 0 : i32
    %c0_i32_1 = arith.constant 0 : i32
    return %c0_i32, %c0_i32_0 : i32, i32
  }
  func.func @transform_4(%arg0: i32) -> (i32, i32) {
    %c0_i32 = arith.constant 0 : i32
    %c0_i32_0 = arith.constant 0 : i32
    %c0_i32_1 = arith.constant 0 : i32
    return %c0_i32, %c0_i32_0 : i32, i32
  }
  func.func @transform_5(%arg0: i32) -> (i32, i32) {
    %c0_i32 = arith.constant 0 : i32
    %c0_i32_0 = arith.constant 0 : i32
    %c0_i32_1 = arith.constant 0 : i32
    return %c0_i32, %c0_i32_0 : i32, i32
  }
  func.func @transform_6(%arg0: i32) -> (i32, i32) {
    %c0_i32 = arith.constant 0 : i32
    %c0_i32_0 = arith.constant 0 : i32
    %c0_i32_1 = arith.constant 0 : i32
    return %c0_i32, %c0_i32_0 : i32, i32
  }
  func.func @transform_7(%arg0: i32) -> (i32, i32) {
    %c0_i32 = arith.constant 0 : i32
    %c0_i32_0 = arith.constant 0 : i32
    return %arg0, %c0_i32 : i32, i32
  }
}

</mosaic_0001>

<bundles_post_ra>
// kernel: tpu_custom_call.1
= control target key start
LH: loop header
LB: loop body
LE: loop exit
PB: predicated region body
PF: predicated region fallthrough
CT: control target
= control target key end

     0   :  { %12 = vsyncpa [#allocation3], 0  ;;  %s468_s24 = smov [#allocation2]   ;;  %s608_s0 = inlined_call_operand.vmem [shape: f32[8,16], index: 0, kind: input, shape index: {}]   ;;  %s609_s1 = inlined_call_operand.hbm [shape: bf16[16,128], index: 1, kind: input, shape index: {}]   ;;  %s610_s2 = inlined_call_operand.vmem [shape: f32[1,128], index: 2, kind: input, shape index: {}]   ;;  %s611_s3 = inlined_call_operand.vmem [shape: bf16[128,128], index: 3, kind: input, shape index: {}]   ;;  %s612_s4 = inlined_call_operand.vmem [shape: f32[1,128], index: 4, kind: input, shape index: {}]   ;;  %s613_s5 = inlined_call_operand.vmem [shape: bf16[128,4], index: 5, kind: input, shape index: {}]   ;;  %s614_s6 = inlined_call_operand.vmem [shape: f32[1,4], index: 6, kind: input, shape index: {}]   ;;  %s615_s7 = inlined_call_operand.vmem [shape: f32[8,4], index: 7, kind: output, shape index: {}]  }
   0x1   :  { %s20_s25 = sshll.u32 %s468_s24, 4  ;;  %s444_s28 = scalar_lea.hbm %s609_s1, 128  ;;  %s21_s25 = int_to_ptr.vmem [resolvable:$true] %s20_s25 }
   0x2   :  { %p445_p0 = scmp.ne.s32.totalorder %s609_s1, %s444_s28  ;;  %p448_p1 = scmp.lt.u32.totalorder %s444_s28, %s609_s1 }
   0x4   :  { %p450_p2 = pnand %p448_p1, %p445_p0 }
   0x6   :  { %453 = shalt.err (!%p450_p2)
}
   0x7   :  { %s454_s10 = scalar_lea.vmem %s21_s25, 128  ;;  %p459_p4 = scmp.lt.s32.totalorder %s21_s25, %s21_s25 }
   0x8   :  { %p455_p3 = scmp.ne.s32.totalorder %s21_s25, %s454_s10  ;;  %p460_p5 = scmp.lt.s32.totalorder %s454_s10, %s454_s10 }
   0xa   :  { %p461_p6 = por %p460_p5, %p459_p4 }
   0xc   :  { %p462_p7 = pnand %p461_p6, %p455_p3 }
   0xe   :  { %465 = shalt.err (!%p462_p7)
}
   0xf   :  { %s469_s11 = smov 64   ;;  %s470_s12 = smov 4  }
  0x10   :  { %26 = dma.hbm_to_vmem [thread:$0]  %s609_s1, 128, %s21_s25, [#allocation3], %s469_s11, %s469_s11, %s470_s12  }
  0x11   :  { %466 = dma.done.wait [#allocation3], 128  }
  0x12   :  { %467 = vsyncadd [#allocation3], 4294967168  ;;  %v471_v0 = vmov 0.0   ;;  %vm472_vm0 = vmmov 0   ;;  %v427_v1 = vld [vmem:[#allocation2] sm:$0xff]   ;;  %vm58_vm1 = vcmask 130048  }
  0x13   :  { %376 = vmatprep.subr.bf16.mxu0 %v471_v0  ;;  %378 = vmatprep.mubr.msk.bf16.mxu0 %vm472_vm0, %v471_v0  ;;  %v41_v2 = vld [vmem:[%s608_s0] sm:$0xff]  ;;  %v429_v5 = vld [vmem:[%s611_s3 + $0x8] sm:$0xff]   ;;  %v430_v6 = vld [vmem:[%s611_s3 + $0x10] sm:$0xff]   ;;  %vm328_vm2 = vcmask 31744  }
  0x14   :  { %382 = vmatprep.subr.bf16.mxu1 %v471_v0  ;;  %398 = vmatprep.mubr.msk.bf16.mxu1 %vm472_vm0, %v471_v0  ;;  %v42_v3 = vpack.c.bf16 %v41_v2, %v41_v2  ;;  %v428_v4 = vld [vmem:[%s611_s3] sm:$0xff]   ;;  %v431_v7 = vld [vmem:[%s611_s3 + $0x18] sm:$0xff]   ;;  %v433_v9 = vld [vmem:[%s611_s3 + $0x28] sm:$0xff]  }
  0x15   :  { %377 = vmatpush3.bf16.msra.mxu0 %v427_v1  ;;  %383 = vmatpush3.bf16.msra.mxu1 %v428_v4  ;;  %v432_v8 = vld [vmem:[%s611_s3 + $0x20] sm:$0xff]   ;;  %v434_v10 = vld [vmem:[%s611_s3 + $0x30] sm:$0xff]   ;;  %v435_v11 = vld [vmem:[%s611_s3 + $0x38] sm:$0xff]  }
  0x16   :  { %402 = vmatprep.subr.bf16.mxu0 %v471_v0  ;;  %384 = vmatprep.subr.bf16.mxu1 %v471_v0  ;;  %v436_v12 = vld [vmem:[%s613_s5] sm:$0xff]   ;;  %v437_v13 = vld [vmem:[%s613_s5 + $0x8] sm:$0xff]   ;;  %v438_v14 = vld [vmem:[%s613_s5 + $0x10] sm:$0xff]  }
  0x17   :  { %v439_v15 = vld [vmem:[%s613_s5 + $0x18] sm:$0xff]   ;;  %v440_v16 = vld [vmem:[%s613_s5 + $0x20] sm:$0xff]   ;;  %v441_v17 = vld [vmem:[%s613_s5 + $0x28] sm:$0xff]  }
  0x18   :  { %379 = vmatmul.mubr.msk.bf16.vlgmr.msra.gmra.mrb[0].mxu0 %vm58_vm1, %v42_v3  ;;  %v335_v18 = vld [vmem:[%s610_s2] ss:$0 sm:$0xff]  ;;  %v442_v26 = vld [vmem:[%s613_s5 + $0x30] sm:$0xff]   ;;  %v443_v27 = vld [vmem:[%s613_s5 + $0x38] sm:$0xff]  }
  0x19   :  { %418 = vmatprep.mubr.msk.bf16.mxu0 %vm472_vm0, %v471_v0  ;;  %385 = vmatpush3.bf16.msra.mxu1 %v429_v5  ;;  %v338_v28 = vld [vmem:[%s612_s4] ss:$0 sm:$0xff] }
  0x1a   :  { %386 = vmatprep.subr.bf16.mxu1 %v471_v0  ;;  %403 = vmatpush3.bf16.msra.mxu0 %v436_v12  ;;  %v347_v36 = vld [vmem:[%s614_s6] ss:$0 sm:$0xff] }
  0x1b   :  { %404 = vmatprep.subr.bf16.mxu0 %v471_v0 }
  0x1d   :  { %387 = vmatpush3.bf16.msra.mxu1 %v430_v6 }
  0x1e   :  { %388 = vmatprep.subr.bf16.mxu1 %v471_v0  ;;  %405 = vmatpush3.bf16.msra.mxu0 %v437_v13 }
  0x1f   :  { %406 = vmatprep.subr.bf16.mxu0 %v471_v0 }
  0x21   :  { %389 = vmatpush3.bf16.msra.mxu1 %v431_v7 }
  0x22   :  { %390 = vmatprep.subr.bf16.mxu1 %v471_v0  ;;  %407 = vmatpush3.bf16.msra.mxu0 %v438_v14 }
  0x23   :  { %408 = vmatprep.subr.bf16.mxu0 %v471_v0 }
  0x25   :  { %391 = vmatpush3.bf16.msra.mxu1 %v432_v8 }
  0x26   :  { %392 = vmatprep.subr.bf16.mxu1 %v471_v0  ;;  %409 = vmatpush3.bf16.msra.mxu0 %v439_v15 }
  0x27   :  { %410 = vmatprep.subr.bf16.mxu0 %v471_v0 }
  0x29   :  { %393 = vmatpush3.bf16.msra.mxu1 %v433_v9 }
  0x2a   :  { %394 = vmatprep.subr.bf16.mxu1 %v471_v0  ;;  %411 = vmatpush3.bf16.msra.mxu0 %v440_v16 }
  0x2b   :  { %412 = vmatprep.subr.bf16.mxu0 %v471_v0 }
  0x2d   :  { %395 = vmatpush3.bf16.msra.mxu1 %v434_v10 }
  0x2e   :  { %396 = vmatprep.subr.bf16.mxu1 %v471_v0  ;;  %413 = vmatpush3.bf16.msra.mxu0 %v441_v17 }
  0x2f   :  { %414 = vmatprep.subr.bf16.mxu0 %v471_v0 }
  0x31   :  { %397 = vmatpush3.bf16.msra.mxu1 %v435_v11 }
  0x32   :  { %415 = vmatpush3.bf16.msra.mxu0 %v442_v26 }
  0x33   :  { %416 = vmatprep.subr.bf16.mxu0 %v471_v0 }
  0x36   :  { %417 = vmatpush3.bf16.msra.mxu0 %v443_v27 }
  0xeb   :  { %v96_v19 = vpop.f32.mrb[0].mxu0 }
  0xec   :  { %v97_v20 = vadd.f32 %v335_v18, %v96_v19  ;;  %v380_v21 = vpop.f32.mrb[1].mxu0 }
  0xed   :  { %v99_v22 = vpop.f32.mrb[2].mxu0 }
  0xee   :  { %v102_v23 = vmax.f32 %v97_v20, 0.0  ;;  %v381_v24 = vpop.f32.mrb[3].mxu0 }
  0xf0   :  { %v103_v25 = vpack.c.bf16 %v102_v23, %v102_v23 }
  0xf2   :  { %399 = vmatmul.mubr.bf16.vlgmr.msra.gmra.mrb[0].mxu1 %v103_v25 }
 0x1c5   :  { %v209_v29 = vpop.f32.mrb[0].mxu1 }
 0x1c6   :  { %v210_v30 = vadd.f32 %v338_v28, %v209_v29  ;;  %v400_v31 = vpop.f32.mrb[1].mxu1 }
 0x1c7   :  { %v212_v32 = vpop.f32.mrb[2].mxu1 }
 0x1c8   :  { %v215_v33 = vmax.f32 %v210_v30, 0.0  ;;  %v401_v34 = vpop.f32.mrb[3].mxu1 }
 0x1ca   :  { %v216_v35 = vpack.c.bf16 %v215_v33, %v215_v33 }
 0x1cc   :  { %419 = vmatmul.mubr.bf16.vlgmr.msra.gmra.mrb[4].mxu0 %v216_v35 }
 0x29f   :  { %v322_v37 = vpop.f32.mrb[4].mxu0 }
 0x2a0   :  { %v323_v38 = vadd.f32 %v347_v36, %v322_v37  ;;  %v420_v39 = vpop.f32.mrb[5].mxu0 }
 0x2a1   :  { %v325_v40 = vpop.f32.mrb[6].mxu0 }
 0x2a2   :  { %329 = vst.msk [vmem:[%s615_s7] sm:$0xff] %vm328_vm2, %v323_v38  ;;  %v421_v41 = vpop.f32.mrb[7].mxu0 }
 0x2a3   :  { %334 = vsyncpa [#allocation3], 1 }

</bundles_post_ra>
